<compile_context>
chip_gen: v7x
topology: tpu7x:2x2x1
jax: 0.10.0
libtpu: 0.0.40
codegen_flags: <defaults>
</compile_context>

<pallas_src>
import functools
import math

import jax
import jax.numpy as jnp
from jax.experimental import pallas as pl
from jax.experimental.pallas import tpu as pltpu


def _std_kernel(x_ref, o_ref, *, inv_n, inv_denom):
    """Per-tile standard deviation over axis 1 of the slab.

    x_ref : (ta, K, tb) or (ta, K)   input tile
    o_ref : (ta, 1, tb) or (ta, 1)   std, keepdims over the reduce axis
    """
    x = x_ref[...].astype(jnp.float32)
    mean = jnp.sum(x, axis=1, keepdims=True) * inv_n
    diff = x - mean
    var = jnp.sum(diff * diff, axis=1, keepdims=True) * inv_denom
    o_ref[...] = jnp.sqrt(var).astype(o_ref.dtype)


# Per-step input-tile budget: 2-deep buffering of (input + tiny output) stays
# well under 16 MiB scoped VMEM (v5e default) and 32 MiB (v6e / v7x).
_TILE_BUDGET_BYTES = 2 * 1024 * 1024


def std_forward(x, dim, keepdim=False, correction=1):
    """Pallas equivalent of torch.Tensor.std(dim, keepdim) (unbiased by default)."""
    if isinstance(dim, (tuple, list)):
        # TODO(synk): tuple-of-dims reduction not implemented; only int dim.
        raise NotImplementedError("std_forward only supports a single int dim")

    nd = x.ndim
    d = dim % nd
    shape = x.shape
    K = shape[d]
    A = int(math.prod(shape[:d]))
    B = int(math.prod(shape[d + 1:]))

    inv_n = 1.0 / K
    denom = K - correction
    inv_denom = (1.0 / denom) if denom > 0 else float("nan")  # matches torch NaN
    kernel = functools.partial(_std_kernel, inv_n=inv_n, inv_denom=inv_denom)

    itemsize = jnp.dtype(x.dtype).itemsize

    if B > 1:
        # 3D slab (A, K, B): reduce axis 1; trailing axis B stays lane-dense.
        x3 = x.reshape(A, K, B)
        tb = min(B, 1024) if B % 128 == 0 else B  # multiple of 128 or full B
        ta_cap = max(1, _TILE_BUDGET_BYTES // (K * tb * itemsize))
        ta = A if ta_cap >= A else max(1, ta_cap)
        grid = (pl.cdiv(A, ta), pl.cdiv(B, tb))
        out = pl.pallas_call(
            kernel,
            out_shape=jax.ShapeDtypeStruct((A, 1, B), x.dtype),
            grid=grid,
            in_specs=[pl.BlockSpec((ta, K, tb), lambda i, j: (i, 0, j))],
            out_specs=pl.BlockSpec((ta, 1, tb), lambda i, j: (i, 0, j)),
            compiler_params=pltpu.CompilerParams(
                dimension_semantics=("parallel", "parallel")),
        )(x3)
    else:
        # Reduction over the last axis: 2D slab (A, K), reduce over lanes.
        # TODO(synk): a K that does not fit a single VMEM tile would need a
        # K-tiled accumulation grid; not needed at these sizes.
        x2 = x.reshape(A, K)
        ta_cap = max(1, _TILE_BUDGET_BYTES // (K * itemsize))
        if ta_cap >= A:
            ta = A
        else:
            ta = max(8, ta_cap - ta_cap % 8)  # sublane-dense row tile
            ta = min(ta, A)                   # ta == A (full) is also legal
        grid = (pl.cdiv(A, ta),)
        out = pl.pallas_call(
            kernel,
            out_shape=jax.ShapeDtypeStruct((A, 1), x.dtype),
            grid=grid,
            in_specs=[pl.BlockSpec((ta, K), lambda i: (i, 0))],
            out_specs=pl.BlockSpec((ta, 1), lambda i: (i, 0)),
            compiler_params=pltpu.CompilerParams(
                dimension_semantics=("parallel",)),
        )(x2)

    out_shape = shape[:d] + ((1,) if keepdim else ()) + shape[d + 1:]
    return out.reshape(out_shape)


class StdPallas:
    """Mirror of the torch Std module (no learnable parameters)."""

    def __init__(self, dim, keepdim=False):
        self.dim = dim
        self.keepdim = keepdim

    def __call__(self, x):
        return std_forward(x, self.dim, self.keepdim)

    def extra_repr(self):
        return f"{self.dim}, keepdim={self.keepdim}"


if __name__ == "__main__":
    key = jax.random.PRNGKey(0)
    # small NCHW-like input consistent with the module's usage
    x = jax.random.normal(key, (2, 4, 16, 16), dtype=jnp.float32)

    # channel std, like Std(dim=1)
    mod = StdPallas(dim=1, keepdim=False)
    y = jax.block_until_ready(mod(x))
    ref = jnp.std(x, axis=1, ddof=1)
    assert y.shape == ref.shape and y.dtype == x.dtype
    assert bool(jnp.allclose(y, ref, rtol=1e-5, atol=1e-5))

    # last-dim std with keepdim, exercising the 2D (lane-reduction) path
    mod2 = StdPallas(dim=-1, keepdim=True)
    y2 = jax.block_until_ready(mod2(x))
    ref2 = jnp.std(x, axis=-1, ddof=1, keepdims=True)
    assert y2.shape == ref2.shape and y2.dtype == x.dtype
    assert bool(jnp.allclose(y2, ref2, rtol=1e-5, atol=1e-5))

    print("KERNEL_OK")
</pallas_src>

<mosaic_0001>
module attributes {stable_mosaic.version = 11 : i64} {
  func.func @_std_kernel(%arg0: i32, %arg1: i32, %arg2: memref<2x4x256xf32, #tpu.memory_space<vmem>>, %arg3: memref<2x1x256xf32, #tpu.memory_space<vmem>>) attributes {dimension_semantics = [#tpu.dimension_semantics<parallel>, #tpu.dimension_semantics<parallel>], iteration_bounds = array<i64: 1, 1>, scalar_prefetch = 0 : i64, scratch_operands = 0 : i64, tpu.core_type = #tpu.core_type<tc>, window_params = [{transform_indices = @transform_0, window_bounds = array<i64: 2, 4, 256>}, {transform_indices = @transform_1, window_bounds = array<i64: 2, 1, 256>}]} {
    %c0 = arith.constant 0 : index
    %c0_0 = arith.constant 0 : index
    %c0_1 = arith.constant 0 : index
    %0 = vector.load %arg2[%c0, %c0_0, %c0_1] : memref<2x4x256xf32, #tpu.memory_space<vmem>>, vector<2x4x256xf32>
    %cst = arith.constant dense<0.000000e+00> : vector<2x256xf32>
    %1 = vector.multi_reduction <add>, %0, %cst [1] : vector<2x4x256xf32> to vector<2x256xf32>
    %2 = vector.shape_cast %1 : vector<2x256xf32> to vector<2x1x256xf32>
    %cst_2 = arith.constant 2.500000e-01 : f32
    %3 = vector.broadcast %cst_2 : f32 to vector<2x1x256xf32>
    %4 = arith.mulf %2, %3 : vector<2x1x256xf32>
    %5 = vector.broadcast %4 : vector<2x1x256xf32> to vector<2x4x256xf32>
    %6 = arith.subf %0, %5 : vector<2x4x256xf32>
    %7 = arith.mulf %6, %6 : vector<2x4x256xf32>
    %cst_3 = arith.constant dense<0.000000e+00> : vector<2x256xf32>
    %8 = vector.multi_reduction <add>, %7, %cst_3 [1] : vector<2x4x256xf32> to vector<2x256xf32>
    %9 = vector.shape_cast %8 : vector<2x256xf32> to vector<2x1x256xf32>
    %cst_4 = arith.constant 0.333333343 : f32
    %10 = vector.broadcast %cst_4 : f32 to vector<2x1x256xf32>
    %11 = arith.mulf %9, %10 : vector<2x1x256xf32>
    %12 = math.sqrt %11 : vector<2x1x256xf32>
    %c0_5 = arith.constant 0 : index
    %c0_6 = arith.constant 0 : index
    %c0_7 = arith.constant 0 : index
    %13 = vector.load %arg3[%c0_5, %c0_6, %c0_7] : memref<2x1x256xf32, #tpu.memory_space<vmem>>, vector<2x1x256xf32>
    tpu.vector_store %arg3[%c0_5, %c0_6, %c0_7], %12 {strides = array<i32>} : memref<2x1x256xf32, #tpu.memory_space<vmem>>, vector<2x1x256xf32>,
    return
  }
  func.func @transform_0(%arg0: i32, %arg1: i32) -> (i32, i32, i32) {
    %c0_i32 = arith.constant 0 : i32
    %c0_i32_0 = arith.constant 0 : i32
    return %arg0, %c0_i32, %arg1 : i32, i32, i32
  }
  func.func @transform_1(%arg0: i32, %arg1: i32) -> (i32, i32, i32) {
    %c0_i32 = arith.constant 0 : i32
    %c0_i32_0 = arith.constant 0 : i32
    return %arg0, %c0_i32, %arg1 : i32, i32, i32
  }
}

</mosaic_0001>

<bundles_post_ra>
// kernel: tpu_custom_call.1
= control target key start
LH: loop header
LB: loop body
LE: loop exit
PB: predicated region body
PF: predicated region fallthrough
CT: control target
= control target key end

     0   :  { %6 = vsyncpa [#allocation3], 0  ;;  %s318_s0 = inlined_call_operand.hbm [shape: f32[2,4,256], index: 0, kind: input, shape index: {}]   ;;  %s319_s1 = inlined_call_operand.hbm [shape: f32[2,1,256], index: 1, kind: output, shape index: {}]  }
   0x1   :  { %7 = vsyncpa [#allocation4], 0  ;;  %s266_s6 = smov [#allocation2]   ;;  %s218_s10 = scalar_lea.hbm %s318_s0, 256 }
   0x2   :  { %s13_s7 = sshll.u32 %s266_s6, 4  ;;  %p219_p0 = scmp.ne.s32.totalorder %s318_s0, %s218_s10  ;;  %s14_s7 = int_to_ptr.vmem [resolvable:$true] %s13_s7 }
   0x3   :  { %p222_p1 = scmp.lt.u32.totalorder %s218_s10, %s318_s0 }
   0x5   :  { %p224_p2 = pnand %p222_p1, %p219_p0 }
   0x7   :  { %227 = shalt.err (!%p224_p2)
}
   0x8   :  { %s228_s15 = scalar_lea.vmem %s14_s7, 256  ;;  %p233_p4 = scmp.lt.s32.totalorder %s14_s7, %s14_s7 }
   0x9   :  { %p229_p3 = scmp.ne.s32.totalorder %s14_s7, %s228_s15  ;;  %p234_p5 = scmp.lt.s32.totalorder %s228_s15, %s228_s15 }
   0xb   :  { %p235_p6 = por %p234_p5, %p233_p4 }
   0xd   :  { %p236_p7 = pnand %p235_p6, %p229_p3 }
   0xf   :  { %239 = shalt.err (!%p236_p7)
}
  0x10   :  { %s267_s16 = smov 128   ;;  %s268_s17 = smov 8  }
  0x11   :  { %19 = dma.hbm_to_vmem [thread:$0]  %s318_s0, 256, %s14_s7, [#allocation3], %s267_s16, %s267_s16, %s268_s17  }
  0x12   :  { %262 = dma.done.wait [#allocation3], 256  }
  0x13   :  { %263 = vsyncadd [#allocation3], 4294967040  ;;  %vm31_vm0 = vcmask 1043456   ;;  %v23_v0 = vld [vmem:[#allocation2] sm:$0xff]  ;;  %v24_v1 = vld [vmem:[#allocation2 + $0x8] sm:$0xff]  ;;  %s270_s0 = smov [#allocation5]  }
  0x14   :  { %v27_v2 = vcombine.high %v23_v0, %v23_v0  ;;  %v32_v3 = vsel %vm31_vm0, %v23_v0, 0.0  ;;  %v28_v4 = vcombine.high %v24_v1, %v24_v1  ;;  %v46_v5 = vsel %vm31_vm0, %v24_v1, 0.0  ;;  %s189_s20 = sshll.u32 %s270_s0, 4  ;;  %s190_s20 = int_to_ptr.vmem [resolvable:$true] %s189_s20 }
  0x15   :  { %v33_v6 = vrot.slane %v32_v3, 4  ;;  %v47_v7 = vrot.slane %v46_v5, 4  ;;  %s240_s21 = scalar_lea.vmem %s190_s20, 64  ;;  %p245_p9 = scmp.lt.s32.totalorder %s190_s20, %s190_s20 }
  0x16   :  { %v39_v8 = vsel %vm31_vm0, %v27_v2, 0.0  ;;  %v53_v9 = vsel %vm31_vm0, %v28_v4, 0.0  ;;  %p241_p8 = scmp.ne.s32.totalorder %s190_s20, %s240_s21  ;;  %p246_p10 = scmp.lt.s32.totalorder %s240_s21, %s240_s21 }
  0x17   :  { %v34_v10 = vadd.f32 %v33_v6, %v32_v3  ;;  %v40_v11 = vrot.slane %v39_v8, 4  ;;  %v48_v12 = vadd.f32 %v47_v7, %v46_v5  ;;  %v54_v13 = vrot.slane %v53_v9, 4 }
  0x18   :  { %p247_p11 = por %p246_p10, %p245_p9 }
  0x19   :  { %v35_v14 = vrot.slane %v34_v10, 2  ;;  %v41_v15 = vadd.f32 %v40_v11, %v39_v8  ;;  %v49_v16 = vrot.slane %v48_v12, 2  ;;  %v55_v17 = vadd.f32 %v54_v13, %v53_v9 }
  0x1a   :  { %v269_v13 = vmov 1966171168   ;;  %p248_p12 = pnand %p247_p11, %p241_p8 }
  0x1b   :  { %v36_v18 = vadd.f32 %v35_v14, %v34_v10  ;;  %v42_v19 = vrot.slane %v41_v15, 2  ;;  %v50_v20 = vadd.f32 %v49_v16, %v48_v12  ;;  %v56_v21 = vrot.slane %v55_v17, 2 }
  0x1c   :  { %v150_v12 = vlaneseq  ;;  %v148_v14 = vunpack.c.l.s4 %v269_v13 }
  0x1d   :  { %v37_v22 = vrot.slane %v36_v18, 1  ;;  %v43_v23 = vadd.f32 %v42_v19, %v41_v15  ;;  %v51_v24 = vrot.slane %v50_v20, 1  ;;  %v57_v25 = vadd.f32 %v56_v21, %v55_v17 }
  0x1e   :  { %v151_v15 = vshrl.u32 %v150_v12, 7  ;;  %vm180_vm9 = vcmp.lt.s32.totalorder %v150_v12, 256 }
  0x1f   :  { %v38_v26 = vadd.f32 %v37_v22, %v36_v18  ;;  %v44_v27 = vrot.slane %v43_v23, 1  ;;  %v52_v28 = vadd.f32 %v51_v24, %v50_v20  ;;  %v58_v29 = vrot.slane %v57_v25, 1 }
  0x20   :  { %v149_v18 = vunpack.c.0.s8 %v148_v14 }
  0x21   :  { %v45_v30 = vadd.f32 %v44_v27, %v43_v23  ;;  %v60_v31 = vmul.f32 0.25, %v38_v26  ;;  %v59_v32 = vadd.f32 %v58_v29, %v57_v25  ;;  %v62_v33 = vmul.f32 0.25, %v52_v28 }
  0x23   :  { %v61_v34 = vmul.f32 0.25, %v45_v30  ;;  %v63_v35 = vmul.f32 0.25, %v59_v32 }
  0x25   :  { %v68_v36 = vcombine.low %v60_v31, %v61_v34  ;;  %v69_v37 = vcombine.low %v62_v33, %v63_v35  ;;  %v152_v33 = vsub.s32 %v149_v18, %v151_v15 }
  0x27   :  { %v72_v38 = vsub.f32 %v23_v0, %v68_v36  ;;  %v73_v39 = vsub.f32 %v24_v1, %v69_v37 }
  0x29   :  { %v74_v40 = vmul.f32 %v72_v38, %v72_v38  ;;  %v75_v41 = vmul.f32 %v73_v39, %v73_v39 }
  0x2b   :  { %v78_v42 = vcombine.high %v74_v40, %v74_v40  ;;  %v82_v43 = vsel %vm31_vm0, %v74_v40, 0.0  ;;  %v79_v44 = vcombine.high %v75_v41, %v75_v41  ;;  %v96_v45 = vsel %vm31_vm0, %v75_v41, 0.0 }
  0x2c   :  { %v83_v46 = vrot.slane %v82_v43, 4  ;;  %v97_v47 = vrot.slane %v96_v45, 4 }
  0x2d   :  { %v89_v48 = vsel %vm31_vm0, %v78_v42, 0.0  ;;  %v103_v49 = vsel %vm31_vm0, %v79_v44, 0.0 }
  0x2e   :  { %v84_v50 = vadd.f32 %v83_v46, %v82_v43  ;;  %v90_v51 = vrot.slane %v89_v48, 4  ;;  %v98_v52 = vadd.f32 %v97_v47, %v96_v45  ;;  %v104_v53 = vrot.slane %v103_v49, 4 }
  0x30   :  { %v85_v54 = vrot.slane %v84_v50, 2  ;;  %v91_v55 = vadd.f32 %v90_v51, %v89_v48  ;;  %v99_v56 = vrot.slane %v98_v52, 2  ;;  %v105_v57 = vadd.f32 %v104_v53, %v103_v49 }
  0x32   :  { %v86_v58 = vadd.f32 %v85_v54, %v84_v50  ;;  %v92_v59 = vrot.slane %v91_v55, 2  ;;  %v100_v60 = vadd.f32 %v99_v56, %v98_v52  ;;  %v106_v61 = vrot.slane %v105_v57, 2 }
  0x34   :  { %v87_v62 = vrot.slane %v86_v58, 1  ;;  %v93_v63 = vadd.f32 %v92_v59, %v91_v55  ;;  %v101_v0 = vrot.slane %v100_v60, 1  ;;  %v107_v1 = vadd.f32 %v106_v61, %v105_v57 }
  0x36   :  { %v88_v2 = vadd.f32 %v87_v62, %v86_v58  ;;  %v94_v3 = vrot.slane %v93_v63, 1  ;;  %v102_v4 = vadd.f32 %v101_v0, %v100_v60  ;;  %v108_v5 = vrot.slane %v107_v1, 1 }
  0x38   :  { %v95_v6 = vadd.f32 %v94_v3, %v93_v63  ;;  %v110_v7 = vmul.f32 0.33333334, %v88_v2  ;;  %v109_v8 = vadd.f32 %v108_v5, %v107_v1  ;;  %v112_v9 = vmul.f32 0.33333334, %v102_v4 }
  0x3a   :  { %v111_v10 = vmul.f32 0.33333334, %v95_v6  ;;  %210 = vrsqrt.f32 %v110_v7  ;;  %v113_v11 = vmul.f32 0.33333334, %v109_v8  ;;  %vm116_vm1 = vcmp.eq.f32.partialorder %v110_v7, inf }
  0x3b   :  { %212 = vrsqrt.f32 %v112_v9  ;;  %vm118_vm2 = vcmp.eq.f32.partialorder %v110_v7, 0.0  ;;  %v119_v17 = vand.u32 2147483648, %v110_v7  ;;  %vm130_vm4 = vcmp.eq.f32.partialorder %v112_v9, inf }
  0x3c   :  { %214 = vrsqrt.f32 %v111_v10  ;;  %vm123_vm3 = vcmp.eq.f32.partialorder %v111_v10, inf  ;;  %v133_v21 = vand.u32 2147483648, %v112_v9  ;;  %vm125_vm5 = vcmp.eq.f32.partialorder %v111_v10, 0.0 }
  0x3d   :  { %216 = vrsqrt.f32 %v113_v11  ;;  %v126_v23 = vand.u32 2147483648, %v111_v10  ;;  %vm132_vm6 = vcmp.eq.f32.partialorder %v112_v9, 0.0  ;;  %vm137_vm7 = vcmp.eq.f32.partialorder %v113_v11, inf }
  0x3e   :  { %v140_v28 = vand.u32 2147483648, %v113_v11  ;;  %vm139_vm8 = vcmp.eq.f32.partialorder %v113_v11, 0.0 }
  0x44   :  { %v211_v16 = vpop.eup %210 }
  0x45   :  { %v213_v19 = vpop.eup %212  ;;  %v115_v20 = vmul.f32 %v211_v16, %v110_v7 }
  0x46   :  { %v215_v22 = vpop.eup %214  ;;  %v129_v24 = vmul.f32 %v213_v19, %v112_v9 }
  0x47   :  { %v217_v25 = vpop.eup %216  ;;  %v117_v26 = vsel %vm116_vm1, %v110_v7, %v115_v20  ;;  %v122_v27 = vmul.f32 %v215_v22, %v111_v10 }
  0x48   :  { %v120_v29 = vsel %vm118_vm2, %v119_v17, %v117_v26  ;;  %v131_v30 = vsel %vm130_vm4, %v112_v9, %v129_v24  ;;  %v136_v31 = vmul.f32 %v217_v25, %v113_v11 }
  0x49   :  { %v124_v32 = vsel %vm123_vm3, %v111_v10, %v122_v27  ;;  %v134_v34 = vsel %vm132_vm6, %v133_v21, %v131_v30 }
  0x4a   :  { %v127_v35 = vsel %vm125_vm5, %v126_v23, %v124_v32  ;;  %v138_v36 = vsel %vm137_vm7, %v113_v11, %v136_v31 }
  0x4b   :  { %v146_v37 = vcombine.low %v120_v29, %v127_v35  ;;  %v141_v38 = vsel %vm139_vm8, %v140_v28, %v138_v36 }
  0x4c   :  { %v161_v39 = vcombine.low %v134_v34, %v141_v38 }
  0x4d   :  { %v153_v40 = vrot.slane %v146_v37, %v152_v33 }
  0x4e   :  { %v168_v41 = vrot.slane %v161_v39, %v152_v33 }
  0x4f   :  { %v160_v42 = vrot.slane %v153_v40, %v152_v33 }
  0x50   :  { %v175_v43 = vrot.slane %v168_v41, %v152_v33 }
  0x51   :  { %182 = vst.msk [vmem:[#allocation5] sm:$0x3] %vm180_vm9, %v160_v42 }
  0x52   :  { %183 = vst.msk [vmem:[#allocation5 + $0x2] sm:$0x3] %vm180_vm9, %v175_v43 }
  0x53   :  { %251 = shalt.err (!%p248_p12)
}
  0x54   :  { %s252_s24 = scalar_lea.hbm %s319_s1, 64 }
  0x55   :  { %p253_p13 = scmp.ne.s32.totalorder %s319_s1, %s252_s24  ;;  %p256_p0 = scmp.lt.u32.totalorder %s252_s24, %s319_s1 }
  0x57   :  { %p258_p1 = pnand %p256_p0, %p253_p13 }
  0x59   :  { %261 = shalt.err (!%p258_p1)
}
  0x5a   :  { %s271_s29 = smov 32   ;;  %s272_s30 = smov 2  }
  0x5b   :  { %195 = dma.vmem_to_hbm [thread:$0]  %s190_s20, 64, %s319_s1, [#allocation4], %s271_s29, %s271_s29, %s272_s30  }
  0x5c   :  { %264 = dma.done.wait [#allocation4], 64  }
  0x5d   :  { %265 = vsyncadd [#allocation4], 4294967232 }
  0x5e   :  { %199 = vsyncpa [#allocation3], 1 }
  0x5f   :  { %200 = vsyncpa [#allocation4], 1 }

</bundles_post_ra>
